<compile_context>
chip_gen: v7x
topology: tpu7x:2x2x1
jax: 0.10.0
libtpu: 0.0.40
codegen_flags: <defaults>
</compile_context>

<pallas_src>
import numpy as np
import jax
import jax.numpy as jnp
from jax import lax
from jax.experimental import pallas as pl
from jax.experimental.pallas import tpu as pltpu

NEG_SLOPE = 0.01  # torch.nn.LeakyReLU default


# --------------------------------------------------------------------------- #
# Kernel
# --------------------------------------------------------------------------- #
def _conv_block_kernel(xp_ref, w1_ref, b1_ref, w2_ref, b2_ref, pool_ref,
                       o_ref, ypad_ref, yrow_ref):
    # xp_ref  : (Nb, H+2, (W+2)*Cin)   bf16  lane-folded, zero-padded input block
    # w1_ref  : (3, (W+2)*Cin, W*Cout) bf16  banded conv1 weights, one slab per dy
    # b1_ref  : (1, W*Cout)            f32   bias tiled along W
    # w2_ref  : (3, W*Cout, W*Cout)    bf16  banded conv2 weights (W padding in-matrix)
    # b2_ref  : (1, W*Cout)            f32
    # pool_ref: (W*Cout, Wp*Cout)      f32   horizontal 2:1 average (0.25 folded in)
    # o_ref   : (Nb, Hp, Wp*Cout)      f32   pooled output block (lane-dense)
    # ypad_ref: (Nb, H+2, W*Cout)      bf16  scratch: conv1 activation, H halo only
    # yrow_ref: (Nb*H, Wp*Cout)        f32   scratch: horizontally pooled rows
    Nb, Hpad, _ = xp_ref.shape
    H = Hpad - 2
    _, Hp, Lp = o_ref.shape           # Hp = H // 2, Lp = Wp * Cout
    L1 = b1_ref.shape[-1]             # W * Cout

    # ---- conv1: 3 per-dy banded MXU matmuls (bf16 in, f32 accumulate) ----
    acc = jnp.zeros((Nb * H, L1), jnp.float32)
    for dy in range(3):
        lhs = xp_ref[:, dy:dy + H, :].reshape(Nb * H, -1)           # (Nb*H, (W+2)*Cin)
        acc = acc + jnp.dot(lhs, w1_ref[dy],
                            preferred_element_type=jnp.float32)
    y1 = acc + b1_ref[...]
    y1 = jnp.where(y1 > 0, y1, NEG_SLOPE * y1)                      # LeakyReLU (f32)

    # ---- re-pad conv1 activation along H only (bf16): border rows zeroed,
    #      interior stored once.  W-boundary handling lives inside w2_ref. ----
    ypad_ref[:, 0:1, :] = jnp.zeros((Nb, 1, L1), jnp.bfloat16)
    ypad_ref[:, H + 1:H + 2, :] = jnp.zeros((Nb, 1, L1), jnp.bfloat16)
    ypad_ref[:, 1:1 + H, :] = y1.reshape(Nb, H, L1).astype(jnp.bfloat16)

    # ---- conv2: 3 per-dy banded MXU matmuls ----
    acc2 = jnp.zeros((Nb * H, L1), jnp.float32)
    for dy in range(3):
        lhs = ypad_ref[:, dy:dy + H, :].reshape(Nb * H, L1)         # bf16
        acc2 = acc2 + jnp.dot(lhs, w2_ref[dy],
                              preferred_element_type=jnp.float32)
    y2 = acc2 + b2_ref[...]
    y2 = jnp.where(y2 > 0, y2, NEG_SLOPE * y2)                      # (Nb*H, W*Cout) f32

    # ---- AvgPool2d(2): horizontal pairs via a tiny f32 matmul (lane-dense result),
    #      vertical pairs via stride-2 row-pair loads on a small f32 scratch ----
    yrow_ref[...] = jnp.dot(y2, pool_ref[...],
                            preferred_element_type=jnp.float32)     # (Nb*H, Wp*Cout)
    pooled = (yrow_ref[pl.ds(0, Nb * Hp, 2), :] +
              yrow_ref[pl.ds(1, Nb * Hp, 2), :])                    # (Nb*Hp, Wp*Cout)
    o_ref[...] = pooled.reshape(Nb, Hp, Lp)


# --------------------------------------------------------------------------- #
# Host-side weight preparation
# --------------------------------------------------------------------------- #
def _banded_conv_weight(w_hwio, w_img, padded_in):
    """Per-dy banded weight for the lane-folded layout.

    out[dy, (w + dx - s)*cin + ci, w*cout + co] = w_hwio[dy, dx, ci, co]
    with s = 0 for a W-padded input (rows span W+2 columns) and s = 1 for an
    unpadded input (rows span W columns; out-of-range taps drop out, which
    implements the zero padding in the W dimension).
    """
    kh, kw, cin, cout = w_hwio.shape
    rows = w_img + 2 if padded_in else w_img
    w_f32 = w_hwio.astype(jnp.float32)
    slabs = []
    for dy in range(kh):
        m = jnp.zeros((rows * cin, w_img * cout), jnp.float32)
        for dx in range(kw):
            k = -dx if padded_in else 1 - dx
            sel = jnp.eye(rows, w_img, k=k, dtype=jnp.float32)      # sel[w+dx-s, w] = 1
            m = m + jnp.kron(sel, w_f32[dy, dx])
        slabs.append(m)
    return jnp.stack(slabs, axis=0)


def _vmem_capacity_bytes():
    try:
        cap = getattr(pltpu.get_tpu_info(), "vmem_capacity_bytes", None)
        if cap:
            return int(cap)
    except Exception:
        pass
    return 64 * 1024 * 1024            # conservative default (v7x per-TensorCore)


def _num_tensorcores():
    try:
        kind = jax.devices()[0].device_kind.lower()
    except Exception:
        return 1
    # v4 / v5p megacore and v7x expose 2 TensorCores per device.
    return 2 if any(tag in kind for tag in ("v4", "v5p", "v7")) else 1


def _round_up(x, m):
    return (x + m - 1) // m * m


def _pick_batch_block(N, H, W, Cin, Cout, vmem_budget_bytes, multi_core):
    """Images per grid step: largest divisor of N fitting a padded-VMEM budget.
    Only on 2-TensorCore chips do we force >= 2 grid steps (megacore split)."""
    lane_in = _round_up((W + 2) * Cin, 128)
    lane_mid = _round_up(W * Cout, 128)
    lane_out = _round_up((W // 2) * Cout, 128)
    per_img = (2 * _round_up(H + 2, 8) * lane_in * 2       # double-buffered bf16 input
               + _round_up(H + 2, 8) * lane_mid * 2        # bf16 H-padded conv1 scratch
               + _round_up(H, 8) * lane_out * 4            # f32 pooled-rows scratch
               + 6 * _round_up(H, 8) * lane_mid * 4        # f32 live activations / spill
               + 2 * _round_up(H // 2, 8) * lane_out * 4)  # double-buffered f32 output
    nb = int(max(1, min(N, vmem_budget_bytes // max(per_img, 1))))
    while N % nb:
        nb -= 1
    if multi_core and N > 1 and N // nb < 2:
        nb = max(1, nb // 2)
        while N % nb:
            nb -= 1
    return nb


# --------------------------------------------------------------------------- #
# Public wrapper
# --------------------------------------------------------------------------- #
def conv_block_forward(x_nchw, w1, b1, w2, b2):
    """x_nchw: (N, Cin, H, W). w1: (3,3,Cin,Cout), w2: (3,3,Cout,Cout) HWIO, b*: (Cout,)."""
    x = jnp.transpose(x_nchw, (0, 2, 3, 1)).astype(jnp.float32)     # NCHW -> NHWC
    N, H, W, Cin = x.shape
    Cout = w1.shape[-1]
    assert H % 2 == 0 and W % 2 == 0, "AvgPool2d(2) tiling assumes even H, W"
    Hp, Wp = H // 2, W // 2

    vmem_cap = _vmem_capacity_bytes()
    Nb = _pick_batch_block(N, H, W, Cin, Cout,
                           vmem_budget_bytes=vmem_cap // 3,
                           multi_core=_num_tensorcores() > 1)
    num_blocks = N // Nb

    # Lane-folded, zero-padded, bf16 input: (N, H+2, (W+2)*Cin).
    xp = jnp.pad(x, ((0, 0), (1, 1), (1, 1), (0, 0)))
    xp = xp.reshape(N, H + 2, (W + 2) * Cin).astype(jnp.bfloat16)

    # Banded per-dy weights: W-dim taps and W-dim zero padding live in the matrices.
    w1b = _banded_conv_weight(w1, W, padded_in=True).astype(jnp.bfloat16)   # (3,(W+2)*Cin,W*Cout)
    w2b = _banded_conv_weight(w2, W, padded_in=False).astype(jnp.bfloat16)  # (3, W*Cout, W*Cout)
    b1t = jnp.tile(b1.astype(jnp.float32), W).reshape(1, W * Cout)
    b2t = jnp.tile(b2.astype(jnp.float32), W).reshape(1, W * Cout)
    # Horizontal 2:1 pooling matrix with the AvgPool 0.25 scale folded in.
    poolm = 0.25 * jnp.kron(jnp.repeat(jnp.eye(Wp, dtype=jnp.float32), 2, axis=0),
                            jnp.eye(Cout, dtype=jnp.float32))               # (W*Cout, Wp*Cout)

    out3 = pl.pallas_call(
        _conv_block_kernel,
        out_shape=jax.ShapeDtypeStruct((N, Hp, Wp * Cout), jnp.float32),
        grid_spec=pltpu.PrefetchScalarGridSpec(
            num_scalar_prefetch=0,
            grid=(num_blocks,),
            in_specs=[
                pl.BlockSpec((Nb, H + 2, (W + 2) * Cin), lambda n: (n, 0, 0)),
                pl.BlockSpec((3, (W + 2) * Cin, W * Cout), lambda n: (0, 0, 0)),
                pl.BlockSpec((1, W * Cout), lambda n: (0, 0)),
                pl.BlockSpec((3, W * Cout, W * Cout), lambda n: (0, 0, 0)),
                pl.BlockSpec((1, W * Cout), lambda n: (0, 0)),
                pl.BlockSpec((W * Cout, Wp * Cout), lambda n: (0, 0)),
            ],
            out_specs=pl.BlockSpec((Nb, Hp, Wp * Cout), lambda n: (n, 0, 0)),
            scratch_shapes=[
                pltpu.VMEM((Nb, H + 2, W * Cout), jnp.bfloat16),   # H-padded conv1 act
                pltpu.VMEM((Nb * H, Wp * Cout), jnp.float32),      # horizontally pooled rows
            ],
        ),
        compiler_params=pltpu.CompilerParams(
            dimension_semantics=("parallel",),
            vmem_limit_bytes=min(int(vmem_cap * 3 // 4), 100 * 1024 * 1024)),
    )(xp, w1b, b1t, w2b, b2t, poolm)

    out = out3.reshape(N, Hp, Wp, Cout)
    return jnp.transpose(out, (0, 3, 1, 2))                         # NHWC -> NCHW


# --------------------------------------------------------------------------- #
# Pure-JAX reference (matches PyTorch ConvBlock semantics)
# --------------------------------------------------------------------------- #
def _reference_forward(x_nchw, w1, b1, w2, b2):
    x = jnp.transpose(x_nchw, (0, 2, 3, 1))
    dn1 = lax.conv_dimension_numbers(x.shape, w1.shape, ('NHWC', 'HWIO', 'NHWC'))
    y = lax.conv_general_dilated(x, w1, (1, 1), 'SAME', dimension_numbers=dn1) + b1
    y = jnp.where(y > 0, y, NEG_SLOPE * y)
    dn2 = lax.conv_dimension_numbers(y.shape, w2.shape, ('NHWC', 'HWIO', 'NHWC'))
    y = lax.conv_general_dilated(y, w2, (1, 1), 'SAME', dimension_numbers=dn2) + b2
    y = jnp.where(y > 0, y, NEG_SLOPE * y)
    N, H, W, C = y.shape
    y = y.reshape(N, H // 2, 2, W // 2, 2, C).mean(axis=(2, 4))
    return jnp.transpose(y, (0, 3, 1, 2))


if __name__ == "__main__":
    # ConvBlock(nin=4, nout=8, kernal=3), small NCHW input.
    N, Cin, Cout, H, W = 2, 4, 8, 16, 16

    key = jax.random.PRNGKey(0)
    kx, kw1, kb1, kw2, kb2 = jax.random.split(key, 5)

    x = jax.random.normal(kx, (N, Cin, H, W), dtype=jnp.float32)
    # Deterministic synthetic parameters (HWIO layout), scaled ~1/sqrt(fan_in).
    w1 = jax.random.normal(kw1, (3, 3, Cin, Cout), dtype=jnp.float32) * (1.0 / np.sqrt(9 * Cin))
    b1 = jax.random.normal(kb1, (Cout,), dtype=jnp.float32) * 0.1
    w2 = jax.random.normal(kw2, (3, 3, Cout, Cout), dtype=jnp.float32) * (1.0 / np.sqrt(9 * Cout))
    b2 = jax.random.normal(kb2, (Cout,), dtype=jnp.float32) * 0.1

    out = jax.block_until_ready(conv_block_forward(x, w1, b1, w2, b2))
    ref = jax.block_until_ready(_reference_forward(x, w1, b1, w2, b2))

    assert out.shape == (N, Cout, H // 2, W // 2), out.shape
    # Tolerance covers the bf16 MXU inputs (accumulation stays f32).
    np.testing.assert_allclose(np.asarray(out), np.asarray(ref), rtol=2e-2, atol=2e-2)

    print("KERNEL_OK")
</pallas_src>

<mosaic_0001>
module attributes {stable_mosaic.version = 11 : i64} {
  func.func @_conv_block_kernel(%arg0: i32, %arg1: memref<2x18x72xbf16, #tpu.memory_space<vmem>>, %arg2: memref<3x72x128xbf16, #tpu.memory_space<vmem>>, %arg3: memref<1x128xf32, #tpu.memory_space<vmem>>, %arg4: memref<3x128x128xbf16, #tpu.memory_space<vmem>>, %arg5: memref<1x128xf32, #tpu.memory_space<vmem>>, %arg6: memref<128x64xf32, #tpu.memory_space<vmem>>, %arg7: memref<2x8x64xf32, #tpu.memory_space<vmem>>, %arg8: memref<2x18x128xbf16, #tpu.memory_space<vmem>>, %arg9: memref<32x64xf32, #tpu.memory_space<vmem>>) attributes {dimension_semantics = [#tpu.dimension_semantics<parallel>], iteration_bounds = array<i64: 1>, scalar_prefetch = 0 : i64, scratch_operands = 2 : i64, tpu.core_type = #tpu.core_type<tc>, window_params = [{transform_indices = @transform_0, window_bounds = array<i64: 2, 18, 72>}, {pipeline_mode = #tpu.pipeline_mode<synchronous>, transform_indices = @transform_1, window_bounds = array<i64: 3, 72, 128>}, {pipeline_mode = #tpu.pipeline_mode<synchronous>, transform_indices = @transform_2, window_bounds = array<i64: 1, 128>}, {pipeline_mode = #tpu.pipeline_mode<synchronous>, transform_indices = @transform_3, window_bounds = array<i64: 3, 128, 128>}, {pipeline_mode = #tpu.pipeline_mode<synchronous>, transform_indices = @transform_4, window_bounds = array<i64: 1, 128>}, {pipeline_mode = #tpu.pipeline_mode<synchronous>, transform_indices = @transform_5, window_bounds = array<i64: 128, 64>}, {transform_indices = @transform_6, window_bounds = array<i64: 2, 8, 64>}]} {
    %cst = arith.constant 0.000000e+00 : f32
    %0 = vector.broadcast %cst : f32 to vector<32x128xf32>
    %c0 = arith.constant 0 : index
    %c0_0 = arith.constant 0 : index
    %c0_1 = arith.constant 0 : index
    %1 = vector.load %arg1[%c0, %c0_0, %c0_1] : memref<2x18x72xbf16, #tpu.memory_space<vmem>>, vector<2x16x72xbf16>
    %2 = vector.shape_cast %1 : vector<2x16x72xbf16> to vector<32x72xbf16>
    %c0_2 = arith.constant 0 : index
    %c0_3 = arith.constant 0 : index
    %c0_4 = arith.constant 0 : index
    %3 = vector.load %arg2[%c0_2, %c0_3, %c0_4] : memref<3x72x128xbf16, #tpu.memory_space<vmem>>, vector<1x72x128xbf16>
    %4 = vector.shape_cast %3 : vector<1x72x128xbf16> to vector<72x128xbf16>
    %cst_5 = arith.constant dense<0.000000e+00> : vector<32x128xf32>
    %5 = tpu.matmul %2, %4, %cst_5 {dimension_numbers = #tpu.dot_dimension_numbers<[1], [0], [0], [1], [0, 0, 1, 1], [], []>} : vector<32x72xbf16>, vector<72x128xbf16>, vector<32x128xf32> -> vector<32x128xf32>
    %6 = arith.addf %0, %5 : vector<32x128xf32>
    %c0_6 = arith.constant 0 : index
    %c1 = arith.constant 1 : index
    %c0_7 = arith.constant 0 : index
    %7 = vector.load %arg1[%c0_6, %c1, %c0_7] : memref<2x18x72xbf16, #tpu.memory_space<vmem>>, vector<2x16x72xbf16>
    %8 = vector.shape_cast %7 : vector<2x16x72xbf16> to vector<32x72xbf16>
    %c1_8 = arith.constant 1 : index
    %c0_9 = arith.constant 0 : index
    %c0_10 = arith.constant 0 : index
    %9 = vector.load %arg2[%c1_8, %c0_9, %c0_10] : memref<3x72x128xbf16, #tpu.memory_space<vmem>>, vector<1x72x128xbf16>
    %10 = vector.shape_cast %9 : vector<1x72x128xbf16> to vector<72x128xbf16>
    %cst_11 = arith.constant dense<0.000000e+00> : vector<32x128xf32>
    %11 = tpu.matmul %8, %10, %cst_11 {dimension_numbers = #tpu.dot_dimension_numbers<[1], [0], [0], [1], [0, 0, 1, 1], [], []>} : vector<32x72xbf16>, vector<72x128xbf16>, vector<32x128xf32> -> vector<32x128xf32>
    %12 = arith.addf %6, %11 : vector<32x128xf32>
    %c0_12 = arith.constant 0 : index
    %c2 = arith.constant 2 : index
    %c0_13 = arith.constant 0 : index
    %13 = vector.load %arg1[%c0_12, %c2, %c0_13] : memref<2x18x72xbf16, #tpu.memory_space<vmem>>, vector<2x16x72xbf16>
    %14 = vector.shape_cast %13 : vector<2x16x72xbf16> to vector<32x72xbf16>
    %c2_14 = arith.constant 2 : index
    %c0_15 = arith.constant 0 : index
    %c0_16 = arith.constant 0 : index
    %15 = vector.load %arg2[%c2_14, %c0_15, %c0_16] : memref<3x72x128xbf16, #tpu.memory_space<vmem>>, vector<1x72x128xbf16>
    %16 = vector.shape_cast %15 : vector<1x72x128xbf16> to vector<72x128xbf16>
    %cst_17 = arith.constant dense<0.000000e+00> : vector<32x128xf32>
    %17 = tpu.matmul %14, %16, %cst_17 {dimension_numbers = #tpu.dot_dimension_numbers<[1], [0], [0], [1], [0, 0, 1, 1], [], []>} : vector<32x72xbf16>, vector<72x128xbf16>, vector<32x128xf32> -> vector<32x128xf32>
    %18 = arith.addf %12, %17 : vector<32x128xf32>
    %c0_18 = arith.constant 0 : index
    %c0_19 = arith.constant 0 : index
    %19 = vector.load %arg3[%c0_18, %c0_19] : memref<1x128xf32, #tpu.memory_space<vmem>>, vector<1x128xf32>
    %20 = vector.broadcast %19 : vector<1x128xf32> to vector<32x128xf32>
    %21 = arith.addf %18, %20 : vector<32x128xf32>
    %cst_20 = arith.constant 0.000000e+00 : f32
    %22 = vector.broadcast %cst_20 : f32 to vector<32x128xf32>
    %23 = arith.cmpf ogt, %21, %22 : vector<32x128xf32>
    %cst_21 = arith.constant 0.00999999977 : f32
    %24 = vector.broadcast %cst_21 : f32 to vector<32x128xf32>
    %25 = arith.mulf %24, %21 : vector<32x128xf32>
    %26 = arith.select %23, %21, %25 : vector<32x128xi1>, vector<32x128xf32>
    %cst_22 = arith.constant 0.000000e+00 : bf16
    %27 = vector.broadcast %cst_22 : bf16 to vector<2x1x128xbf16>
    %c0_23 = arith.constant 0 : index
    %c0_24 = arith.constant 0 : index
    %c0_25 = arith.constant 0 : index
    %28 = vector.load %arg8[%c0_23, %c0_24, %c0_25] : memref<2x18x128xbf16, #tpu.memory_space<vmem>>, vector<2x1x128xbf16>
    tpu.vector_store %arg8[%c0_23, %c0_24, %c0_25], %27 {strides = array<i32>} : memref<2x18x128xbf16, #tpu.memory_space<vmem>>, vector<2x1x128xbf16>,
    %cst_26 = arith.constant 0.000000e+00 : bf16
    %29 = vector.broadcast %cst_26 : bf16 to vector<2x1x128xbf16>
    %c0_27 = arith.constant 0 : index
    %c17 = arith.constant 17 : index
    %c0_28 = arith.constant 0 : index
    %30 = vector.load %arg8[%c0_27, %c17, %c0_28] : memref<2x18x128xbf16, #tpu.memory_space<vmem>>, vector<2x1x128xbf16>
    tpu.vector_store %arg8[%c0_27, %c17, %c0_28], %29 {strides = array<i32>} : memref<2x18x128xbf16, #tpu.memory_space<vmem>>, vector<2x1x128xbf16>,
    %31 = vector.shape_cast %26 : vector<32x128xf32> to vector<2x16x128xf32>
    %32 = arith.truncf %31 : vector<2x16x128xf32> to vector<2x16x128xbf16>
    %c0_29 = arith.constant 0 : index
    %c1_30 = arith.constant 1 : index
    %c0_31 = arith.constant 0 : index
    %33 = vector.load %arg8[%c0_29, %c1_30, %c0_31] : memref<2x18x128xbf16, #tpu.memory_space<vmem>>, vector<2x16x128xbf16>
    tpu.vector_store %arg8[%c0_29, %c1_30, %c0_31], %32 {strides = array<i32>} : memref<2x18x128xbf16, #tpu.memory_space<vmem>>, vector<2x16x128xbf16>,
    %cst_32 = arith.constant 0.000000e+00 : f32
    %34 = vector.broadcast %cst_32 : f32 to vector<32x128xf32>
    %c0_33 = arith.constant 0 : index
    %c0_34 = arith.constant 0 : index
    %c0_35 = arith.constant 0 : index
    %35 = vector.load %arg8[%c0_33, %c0_34, %c0_35] : memref<2x18x128xbf16, #tpu.memory_space<vmem>>, vector<2x16x128xbf16>
    %36 = vector.shape_cast %35 : vector<2x16x128xbf16> to vector<32x128xbf16>
    %c0_36 = arith.constant 0 : index
    %c0_37 = arith.constant 0 : index
    %c0_38 = arith.constant 0 : index
    %37 = vector.load %arg4[%c0_36, %c0_37, %c0_38] : memref<3x128x128xbf16, #tpu.memory_space<vmem>>, vector<1x128x128xbf16>
    %38 = vector.shape_cast %37 : vector<1x128x128xbf16> to vector<128x128xbf16>
    %cst_39 = arith.constant dense<0.000000e+00> : vector<32x128xf32>
    %39 = tpu.matmul %36, %38, %cst_39 {dimension_numbers = #tpu.dot_dimension_numbers<[1], [0], [0], [1], [0, 0, 1, 1], [], []>} : vector<32x128xbf16>, vector<128x128xbf16>, vector<32x128xf32> -> vector<32x128xf32>
    %40 = arith.addf %34, %39 : vector<32x128xf32>
    %c0_40 = arith.constant 0 : index
    %c1_41 = arith.constant 1 : index
    %c0_42 = arith.constant 0 : index
    %41 = vector.load %arg8[%c0_40, %c1_41, %c0_42] : memref<2x18x128xbf16, #tpu.memory_space<vmem>>, vector<2x16x128xbf16>
    %42 = vector.shape_cast %41 : vector<2x16x128xbf16> to vector<32x128xbf16>
    %c1_43 = arith.constant 1 : index
    %c0_44 = arith.constant 0 : index
    %c0_45 = arith.constant 0 : index
    %43 = vector.load %arg4[%c1_43, %c0_44, %c0_45] : memref<3x128x128xbf16, #tpu.memory_space<vmem>>, vector<1x128x128xbf16>
    %44 = vector.shape_cast %43 : vector<1x128x128xbf16> to vector<128x128xbf16>
    %cst_46 = arith.constant dense<0.000000e+00> : vector<32x128xf32>
    %45 = tpu.matmul %42, %44, %cst_46 {dimension_numbers = #tpu.dot_dimension_numbers<[1], [0], [0], [1], [0, 0, 1, 1], [], []>} : vector<32x128xbf16>, vector<128x128xbf16>, vector<32x128xf32> -> vector<32x128xf32>
    %46 = arith.addf %40, %45 : vector<32x128xf32>
    %c0_47 = arith.constant 0 : index
    %c2_48 = arith.constant 2 : index
    %c0_49 = arith.constant 0 : index
    %47 = vector.load %arg8[%c0_47, %c2_48, %c0_49] : memref<2x18x128xbf16, #tpu.memory_space<vmem>>, vector<2x16x128xbf16>
    %48 = vector.shape_cast %47 : vector<2x16x128xbf16> to vector<32x128xbf16>
    %c2_50 = arith.constant 2 : index
    %c0_51 = arith.constant 0 : index
    %c0_52 = arith.constant 0 : index
    %49 = vector.load %arg4[%c2_50, %c0_51, %c0_52] : memref<3x128x128xbf16, #tpu.memory_space<vmem>>, vector<1x128x128xbf16>
    %50 = vector.shape_cast %49 : vector<1x128x128xbf16> to vector<128x128xbf16>
    %cst_53 = arith.constant dense<0.000000e+00> : vector<32x128xf32>
    %51 = tpu.matmul %48, %50, %cst_53 {dimension_numbers = #tpu.dot_dimension_numbers<[1], [0], [0], [1], [0, 0, 1, 1], [], []>} : vector<32x128xbf16>, vector<128x128xbf16>, vector<32x128xf32> -> vector<32x128xf32>
    %52 = arith.addf %46, %51 : vector<32x128xf32>
    %c0_54 = arith.constant 0 : index
    %c0_55 = arith.constant 0 : index
    %53 = vector.load %arg5[%c0_54, %c0_55] : memref<1x128xf32, #tpu.memory_space<vmem>>, vector<1x128xf32>
    %54 = vector.broadcast %53 : vector<1x128xf32> to vector<32x128xf32>
    %55 = arith.addf %52, %54 : vector<32x128xf32>
    %cst_56 = arith.constant 0.000000e+00 : f32
    %56 = vector.broadcast %cst_56 : f32 to vector<32x128xf32>
    %57 = arith.cmpf ogt, %55, %56 : vector<32x128xf32>
    %cst_57 = arith.constant 0.00999999977 : f32
    %58 = vector.broadcast %cst_57 : f32 to vector<32x128xf32>
    %59 = arith.mulf %58, %55 : vector<32x128xf32>
    %60 = arith.select %57, %55, %59 : vector<32x128xi1>, vector<32x128xf32>
    %c0_58 = arith.constant 0 : index
    %c0_59 = arith.constant 0 : index
    %61 = vector.load %arg6[%c0_58, %c0_59] : memref<128x64xf32, #tpu.memory_space<vmem>>, vector<128x64xf32>
    %cst_60 = arith.constant dense<0.000000e+00> : vector<32x64xf32>
    %62 = tpu.matmul %60, %61, %cst_60 {dimension_numbers = #tpu.dot_dimension_numbers<[1], [0], [0], [1], [0, 0, 1, 1], [], []>} : vector<32x128xf32>, vector<128x64xf32>, vector<32x64xf32> -> vector<32x64xf32>
    %c0_61 = arith.constant 0 : index
    %c0_62 = arith.constant 0 : index
    %63 = vector.load %arg9[%c0_61, %c0_62] : memref<32x64xf32, #tpu.memory_space<vmem>>, vector<32x64xf32>
    tpu.vector_store %arg9[%c0_61, %c0_62], %62 {strides = array<i32>} : memref<32x64xf32, #tpu.memory_space<vmem>>, vector<32x64xf32>,
    %c0_63 = arith.constant 0 : index
    %c0_64 = arith.constant 0 : index
    %64 = tpu.strided_load %arg9[%c0_63, %c0_64] {strides = array<i32: 2, 1>} : memref<32x64xf32, #tpu.memory_space<vmem>>, vector<16x64xf32>
    %c1_65 = arith.constant 1 : index
    %c0_66 = arith.constant 0 : index
    %65 = tpu.strided_load %arg9[%c1_65, %c0_66] {strides = array<i32: 2, 1>} : memref<32x64xf32, #tpu.memory_space<vmem>>, vector<16x64xf32>
    %66 = arith.addf %64, %65 : vector<16x64xf32>
    %67 = vector.shape_cast %66 : vector<16x64xf32> to vector<2x8x64xf32>
    %c0_67 = arith.constant 0 : index
    %c0_68 = arith.constant 0 : index
    %c0_69 = arith.constant 0 : index
    %68 = vector.load %arg7[%c0_67, %c0_68, %c0_69] : memref<2x8x64xf32, #tpu.memory_space<vmem>>, vector<2x8x64xf32>
    tpu.vector_store %arg7[%c0_67, %c0_68, %c0_69], %67 {strides = array<i32>} : memref<2x8x64xf32, #tpu.memory_space<vmem>>, vector<2x8x64xf32>,
    return
  }
  func.func @transform_0(%arg0: i32) -> (i32, i32, i32) {
    %c0_i32 = arith.constant 0 : i32
    %c0_i32_0 = arith.constant 0 : i32
    %c0_i32_1 = arith.constant 0 : i32
    return %arg0, %c0_i32, %c0_i32_0 : i32, i32, i32
  }
  func.func @transform_1(%arg0: i32) -> (i32, i32, i32) {
    %c0_i32 = arith.constant 0 : i32
    %c0_i32_0 = arith.constant 0 : i32
    %c0_i32_1 = arith.constant 0 : i32
    %c0_i32_2 = arith.constant 0 : i32
    return %c0_i32, %c0_i32_0, %c0_i32_1 : i32, i32, i32
  }
  func.func @transform_2(%arg0: i32) -> (i32, i32) {
    %c0_i32 = arith.constant 0 : i32
    %c0_i32_0 = arith.constant 0 : i32
    %c0_i32_1 = arith.constant 0 : i32
    return %c0_i32, %c0_i32_0 : i32, i32
  }
  func.func @transform_3(%arg0: i32) -> (i32, i32, i32) {
    %c0_i32 = arith.constant 0 : i32
    %c0_i32_0 = arith.constant 0 : i32
    %c0_i32_1 = arith.constant 0 : i32
    %c0_i32_2 = arith.constant 0 : i32
    return %c0_i32, %c0_i32_0, %c0_i32_1 : i32, i32, i32
  }
  func.func @transform_4(%arg0: i32) -> (i32, i32) {
    %c0_i32 = arith.constant 0 : i32
    %c0_i32_0 = arith.constant 0 : i32
    %c0_i32_1 = arith.constant 0 : i32
    return %c0_i32, %c0_i32_0 : i32, i32
  }
  func.func @transform_5(%arg0: i32) -> (i32, i32) {
    %c0_i32 = arith.constant 0 : i32
    %c0_i32_0 = arith.constant 0 : i32
    %c0_i32_1 = arith.constant 0 : i32
    return %c0_i32, %c0_i32_0 : i32, i32
  }
  func.func @transform_6(%arg0: i32) -> (i32, i32, i32) {
    %c0_i32 = arith.constant 0 : i32
    %c0_i32_0 = arith.constant 0 : i32
    %c0_i32_1 = arith.constant 0 : i32
    return %arg0, %c0_i32, %c0_i32_0 : i32, i32, i32
  }
}

</mosaic_0001>

<bundles_post_ra>
// kernel: tpu_custom_call.1
= control target key start
LH: loop header
LB: loop body
LE: loop exit
PB: predicated region body
PF: predicated region fallthrough
CT: control target
= control target key end

     0   :  { %11 = vsyncpa [#allocation5], 0  ;;  %s1970_s0 = inlined_call_operand.vmem [shape: bf16[2,18,72], index: 0, kind: input, shape index: {}]   ;;  %s1971_s1 = inlined_call_operand.hbm [shape: bf16[3,72,128], index: 1, kind: input, shape index: {}]   ;;  %s1972_s2 = inlined_call_operand.vmem [shape: f32[1,128], index: 2, kind: input, shape index: {}]   ;;  %s1973_s3 = inlined_call_operand.vmem [shape: bf16[3,128,128], index: 3, kind: input, shape index: {}]   ;;  %s1974_s4 = inlined_call_operand.vmem [shape: f32[1,128], index: 4, kind: input, shape index: {}]   ;;  %s1975_s5 = inlined_call_operand.vmem [shape: f32[128,64], index: 5, kind: input, shape index: {}]   ;;  %s1976_s6 = inlined_call_operand.hbm [shape: f32[2,8,64], index: 6, kind: output, shape index: {}]  }
   0x1   :  { %12 = vsyncpa [#allocation6], 0  ;;  %s1607_s21 = smov [#allocation4]   ;;  %s1559_s25 = scalar_lea.hbm %s1971_s1, 1728 }
   0x2   :  { %s20_s22 = sshll.u32 %s1607_s21, 4  ;;  %p1560_p0 = scmp.ne.s32.totalorder %s1971_s1, %s1559_s25  ;;  %s21_s22 = int_to_ptr.vmem [resolvable:$true] %s20_s22 }
   0x3   :  { %p1563_p1 = scmp.lt.u32.totalorder %s1559_s25, %s1971_s1 }
   0x5   :  { %p1565_p2 = pnand %p1563_p1, %p1560_p0 }
   0x7   :  { %1568 = shalt.err (!%p1565_p2)
}
   0x8   :  { %s1569_s30 = scalar_lea.vmem %s21_s22, 1728  ;;  %p1574_p4 = scmp.lt.s32.totalorder %s21_s22, %s21_s22 }
   0x9   :  { %p1570_p3 = scmp.ne.s32.totalorder %s21_s22, %s1569_s30  ;;  %p1575_p5 = scmp.lt.s32.totalorder %s1569_s30, %s1569_s30 }
   0xb   :  { %p1576_p6 = por %p1575_p5, %p1574_p4 }
   0xd   :  { %p1577_p7 = pnand %p1576_p6, %p1570_p3 }
   0xf   :  { %1580 = shalt.err (!%p1577_p7)
}
  0x10   :  { %s1608_s7 = smov 64   ;;  %s1609_s8 = smov 4  }
  0x11   :  { %26 = dma.hbm_to_vmem [thread:$0]  %s1971_s1, 1728, %s21_s22, [#allocation5], %s1608_s7, %s1608_s7, %s1609_s8  }
  0x12   :  { %1603 = dma.done.wait [#allocation5], 1728  }
  0x13   :  { %1604 = vsyncadd [#allocation5], 4294965568  ;;  %v1516_v0 = vld [vmem:[#allocation4 + $0x24] sm:$0xff]   ;;  %v1517_v1 = vld [vmem:[#allocation4 + $0x2c] sm:$0xff]   ;;  %vm54_vm0 = vsmask.f32 3328 }
  0x14   :  { %1319 = vmatprep.subr.bf16.mxu0 %v1516_v0  ;;  %v1518_v2 = vld [vmem:[#allocation4 + $0x34] sm:$0xff]   ;;  %v1663_v3 = vld [vmem:[%s1970_s0] sm:$0xf]  ;;  %vm55_vm1 = vsmask.f32 7440  ;;  %v1519_v13 = vld [vmem:[#allocation4 + $0x3c] sm:$0xff]  }
  0x15   :  { %1320 = vmatpush3.bf16.msra.mxu0 %v1516_v0  ;;  %v1668_v4 = vld [vmem:[%s1970_s0 + $0x4] sm:$0xf]  ;;  %v1673_v5 = vld [vmem:[%s1970_s0 + $0x8] sm:$0x1]  ;;  %v58_v6 = vshrl.u32 %v1663_v3, 16  ;;  %v61_v7 = vshll.u32 %v1663_v3, 16  ;;  %vm1699_vm2 = vmor %vm54_vm0, %vm55_vm1 }
  0x16   :  { %1321 = vmatprep.subr.bf16.mxu0 %v1517_v1  ;;  %v67_v8 = vshll.u32 %v1668_v4, 16  ;;  %v71_v9 = vshrl.u32 %v1668_v4, 16  ;;  %v77_v10 = vshll.u32 %v1673_v5, 16  ;;  %v1683_v17 = vld [vmem:[%s1970_s0 + $0xc] sm:$0xf]  ;;  %vm155_vm3 = vcmask 1043456  }
  0x17   :  { %v60_v11 = vrot.slane %v58_v6, 4  ;;  %v63_v12 = vrot.slane %v61_v7, 5  ;;  %v1520_v18 = vld [vmem:[#allocation4 + $0x44] ss:$0 sps:$4 sm:$0xff]   ;;  %v1688_v20 = vld [vmem:[%s1970_s0 + $0x10] sm:$0xf]  ;;  %v1154_v50 = vcombine.low %v1663_v3, %v1668_v4 }
  0x18   :  { %v69_v14 = vrot.slane %v67_v8, 5  ;;  %v73_v15 = vrot.slane %v71_v9, 4  ;;  %v79_v16 = vrot.slane %v77_v10, 5  ;;  %v1693_v21 = vld [vmem:[%s1970_s0 + $0x14] sm:$0x1]  ;;  %v82_v22 = vshrl.u32 %v1683_v17, 16 }
  0x19   :  { %1322 = vmatpush3.bf16.msra.mxu0 %v1517_v1  ;;  %v64_v19 = vor.u32 %v63_v12, %v60_v11  ;;  %v85_v23 = vshll.u32 %v1683_v17, 16  ;;  %v91_v26 = vshll.u32 %v1688_v20, 16  ;;  %v95_v27 = vshrl.u32 %v1688_v20, 16  ;;  %v1525_v43 = vld [vmem:[#allocation4 + $0x20] ss:$0 sps:$4 sm:$0xff]   ;;  %v1522_v51 = vld [vmem:[#allocation4 + $0x8] sm:$0xff]  }
  0x1a   :  { %1323 = vmatprep.subr.bf16.mxu0 %v1518_v2  ;;  %v74_v25 = vor.u32 %v73_v15, %v69_v14  ;;  %v101_v28 = vshll.u32 %v1693_v21, 16  ;;  %v84_v30 = vrot.slane %v82_v22, 4  ;;  %vm148_vm4 = vcmask 588800   ;;  %v1521_v44 = vld [vmem:[#allocation4] sm:$0xff]   ;;  %v303_v52 = vld [vmem:[%s1970_s0] sm:$0xe] }
  0x1b   :  { %v65_v29 = vrot.slane %v64_v19, 4  ;;  %v87_v31 = vrot.slane %v85_v23, 5  ;;  %v93_v33 = vrot.slane %v91_v26, 5  ;;  %v97_v34 = vrot.slane %v95_v27, 4  ;;  %v1523_v57 = vld [vmem:[#allocation4 + $0x10] sm:$0xff]   ;;  %v1524_v59 = vld [vmem:[#allocation4 + $0x18] sm:$0xff]  }
  0x1c   :  { %v75_v32 = vrot.slane %v74_v25, 4  ;;  %v103_v39 = vrot.slane %v101_v28, 5  ;;  %v157_v40 = vsel %vm155_vm3, %v1520_v18, 0  ;;  %v314_v47 = vrot.slane %v1668_v4, 5  ;;  %v1527_v60 = vld [vmem:[#allocation4 + $0x48] sm:$0xff]   ;;  %v1529_v1 = vld [vmem:[#allocation4 + $0x50] sm:$0xff]  }
  0x1d   :  { %1324 = vmatpush3.bf16.msra.mxu0 %v1518_v2  ;;  %v70_v35 = vsel %vm1699_vm2, %v65_v29, %v69_v14  ;;  %v88_v36 = vor.u32 %v87_v31, %v84_v30  ;;  %v98_v38 = vor.u32 %v97_v34, %v93_v33  ;;  %vm309_vm5 = vcmask 1042432   ;;  %v1530_v2 = vld [vmem:[#allocation4 + $0x58] sm:$0xff]   ;;  %v1531_v4 = vld [vmem:[#allocation4 + $0x60] sm:$0xff]   ;;  %v1532_v9 = vld [vmem:[#allocation4 + $0x68] ss:$0 sps:$4 sm:$0xff]  }
  0x1e   :  { %1325 = vmatprep.subr.bf16.mxu0 %v1519_v13  ;;  %v80_v37 = vsel %vm1699_vm2, %v75_v32, %v79_v16  ;;  %vm310_vm6 = vcmask 1046532   ;;  %v317_v53 = vrot.slane %v1673_v5, 5  ;;  %v252_v54 = vsel %vm155_vm3, %v1525_v43, 0  ;;  %v304_v5 = vld [vmem:[%s1970_s0 + $0xc] sm:$0xe]  ;;  %v1533_v14 = vld [vmem:[%s1973_s3 + $0x40] sm:$0xff]  }
  0x1f   :  { %v1145_v41 = vcombine.low %v70_v35, %v80_v37  ;;  %v89_v42 = vrot.slane %v88_v36, 4  ;;  %v99_v45 = vrot.slane %v98_v38, 4  ;;  %v1163_v55 = vrot.slane %v303_v52, 9  ;;  %vm1727_vm7 = vmor %vm309_vm5, %vm310_vm6  ;;  %v460_v16 = vld [vmem:[#allocation2 + $0xc] sm:$0x1]  ;;  %1361 = vmatprep.subr.bf16.mxu1 %v1533_v14  ;;  %v1534_v25 = vld [vmem:[%s1973_s3 + $0x48] sm:$0xff]  }
  0x20   :  { %v316_v56 = vrot.slane %v314_v47, 4  ;;  %v1155_v63 = vcombine.low %v1683_v17, %v1688_v20  ;;  %v321_v3 = vrot.slane %v1688_v20, 5  ;;  %v324_v6 = vrot.slane %v1693_v21, 5  ;;  %v457_v17 = vld [vmem:[#allocation2] sm:$0x1]  ;;  %1362 = vmatpush3.bf16.msra.mxu1 %v1533_v14  ;;  %v1535_v26 = vld [vmem:[%s1973_s3 + $0x50] sm:$0xff]  }
  0x21   :  { %1326 = vmatpush3.bf16.msra.mxu0 %v1519_v13  ;;  %1329 = vmatprep.mubr.msk.bf16.mxu0 %vm148_vm4, %v1145_v41  ;;  %v94_v46 = vsel %vm1699_vm2, %v89_v42, %v93_v33  ;;  %v104_v48 = vsel %vm1699_vm2, %v99_v45, %v103_v39  ;;  %v315_v61 = vsel %vm1727_vm7, %v1163_v55, %v314_v47  ;;  %v1164_v7 = vrot.slane %v304_v5, 9  ;;  %v465_v20 = vld [vmem:[#allocation2 + $0x8] sm:$0x1]  ;;  %v468_v21 = vld [vmem:[#allocation2 + $0x14] sm:$0x1]  ;;  %v1536_v27 = vld [vmem:[%s1973_s3 + $0x58] sm:$0xff]  }
  0x22   :  { %1507 = vmatprep.subr.msk.bf16.mxu0 %vm155_vm3, %v1520_v18  ;;  %v1146_v49 = vcombine.low %v94_v46, %v104_v48  ;;  %v318_v62 = vsel %vm1727_vm7, %v316_v56, %v317_v53  ;;  %v323_v8 = vrot.slane %v321_v3, 4  ;;  %v376_v12 = vsel %vm155_vm3, %v1532_v9, 0  ;;  %1363 = vmatprep.subr.bf16.mxu1 %v1534_v25  ;;  %v1537_v28 = vld [vmem:[%s1973_s3 + $0x60] sm:$0xff]   ;;  %v1538_v29 = vld [vmem:[%s1973_s3 + $0x68] sm:$0xff]   ;;  %v1539_v30 = vld [vmem:[%s1973_s3 + $0x70] sm:$0xff]  }
  0x23   :  { %v1165_v0 = vcombine.low %v315_v61, %v318_v62  ;;  %v322_v10 = vsel %vm1727_vm7, %v1164_v7, %v321_v3  ;;  %vm454_vm8 = vcmask 1040384   ;;  %vm455_vm9 = vsmask.f32 256  ;;  %v1540_v31 = vld [vmem:[%s1973_s3 + $0x78] sm:$0xff]   ;;  %v1789_v32 = vld [vmem:[%s1973_s3] sm:$0xff]   ;;  %v1012_v34 = vld [vmem:[%s1975_s5 + $0x8] sm:$0xff] }
  0x24   :  { %v325_v11 = vsel %vm1727_vm7, %v323_v8, %v324_v6  ;;  %vm1756_vm10 = vmand %vm454_vm8, %vm455_vm9  ;;  %vm463_vm11 = vsmask.f32 7938  ;;  %1364 = vmatpush3.bf16.msra.mxu1 %v1534_v25  ;;  %v1011_v33 = vld [vmem:[%s1975_s5] sm:$0xff]  ;;  %v1013_v35 = vld [vmem:[%s1975_s5 + $0x10] sm:$0xff]  ;;  %vm483_vm1 = vsmask.f32 4368 }
  0x25   :  { %1328 = vmatpush3.bf16.msra.mxu0 %v157_v40  ;;  %v1166_v13 = vcombine.low %v322_v10, %v325_v11  ;;  %v461_v18 = vsel %vm1756_vm10, 0, %v460_v16  ;;  %v458_v19 = vsel %vm1756_vm10, 0, %v457_v17  ;;  %vm464_vm12 = vmand %vm454_vm8, %vm463_vm11  ;;  %1365 = vmatprep.subr.bf16.mxu1 %v1535_v26  ;;  %v1459_v36 = vpack.c.bf16 %v1012_v34, %v1011_v33  ;;  %v1014_v37 = vld [vmem:[%s1975_s5 + $0x18] sm:$0xff]  ;;  %v1015_v39 = vld [vmem:[%s1975_s5 + $0x20] sm:$0xff] }
  0x26   :  { %1333 = vmatprep.subr.bf16.mxu0 %v1521_v44  ;;  %462 = vst [vmem:[#allocation2 + $0xc] sm:$0x1] %v461_v18  ;;  %v466_v22 = vsel %vm464_vm12, 0, %v465_v20  ;;  %v469_v23 = vsel %vm464_vm12, 0, %v468_v21  ;;  %459 = vst [vmem:[#allocation2] sm:$0x1] %v458_v19  ;;  %v1463_v38 = vpack.c.bf16 %v1014_v37, %v1013_v35 }
  0x27   :  { %467 = vst [vmem:[#allocation2 + $0x8] sm:$0x1] %v466_v22  ;;  %470 = vst [vmem:[#allocation2 + $0x14] sm:$0x1] %v469_v23  ;;  %v1016_v40 = vld [vmem:[%s1975_s5 + $0x28] sm:$0xff]  ;;  %v1017_v42 = vld [vmem:[%s1975_s5 + $0x30] sm:$0xff] }
  0x28   :  { %1330 = vmatmul.mubr.msk.bf16.vlgmr.msra.gmra.mrb[0].mxu0 %vm148_vm4, %v1146_v49  ;;  %1366 = vmatpush3.bf16.msra.mxu1 %v1535_v26  ;;  %v1467_v41 = vpack.c.bf16 %v1016_v40, %v1015_v39  ;;  %v1019_v45 = vld [vmem:[%s1975_s5 + $0x40] sm:$0xff]  ;;  %v1020_v46 = vld [vmem:[%s1975_s5 + $0x48] sm:$0xff]  ;;  %v1021_v48 = vld [vmem:[%s1975_s5 + $0x50] sm:$0xff]  ;;  %vm1112_vm8 = vcmask 523264  }
  0x29   :  { %1334 = vmatpush3.bf16.msra.mxu0 %v1521_v44  ;;  %1343 = vmatprep.mubr.msk.bf16.mxu0 %vm148_vm4, %v1154_v50  ;;  %v1475_v47 = vpack.c.bf16 %v1020_v46, %v1019_v45  ;;  %v1022_v49 = vld [vmem:[%s1975_s5 + $0x58] sm:$0xff]  ;;  %vm1838_vm5 = vmor %vm455_vm9, %vm483_vm1  ;;  %v1544_v24 = vld [vmem:[%s1973_s3 + $0x10] sm:$0xff]  }
  0x2a   :  { %1335 = vmatprep.subr.bf16.mxu0 %v1522_v51  ;;  %1367 = vmatprep.subr.bf16.mxu1 %v1536_v27  ;;  %v1479_v50 = vpack.c.bf16 %v1022_v49, %v1021_v48  ;;  %v1554_v58 = vld [vmem:[%s1973_s3 + $0x98] sm:$0xff]  }
  0x2c   :  { %1368 = vmatpush3.bf16.msra.mxu1 %v1536_v27 }
  0x2d   :  { %1336 = vmatpush3.bf16.msra.mxu0 %v1522_v51  ;;  %1369 = vmatprep.subr.bf16.mxu1 %v1537_v28  ;;  %v1174_v51 = vld [vmem:[%s1972_s2] ss:$0 sm:$0xff]  ;;  %v534_v16 = vld [vmem:[#allocation2 + $0xc] sm:$0xf]  ;;  %v527_v21 = vld [vmem:[#allocation2] sm:$0xf] }
  0x2e   :  { %1337 = vmatprep.subr.bf16.mxu0 %v1523_v57  ;;  %v538_v27 = vld [vmem:[#allocation2 + $0x14] sm:$0x1]  ;;  %v531_v35 = vld [vmem:[#allocation2 + $0x8] sm:$0x1] }
  0x30   :  { %1370 = vmatpush3.bf16.msra.mxu1 %v1537_v28 }
  0x31   :  { %1338 = vmatpush3.bf16.msra.mxu0 %v1523_v57  ;;  %1371 = vmatprep.subr.bf16.mxu1 %v1538_v29 }
  0x32   :  { %1339 = vmatprep.subr.bf16.mxu0 %v1524_v59 }
  0x34   :  { %1372 = vmatpush3.bf16.msra.mxu1 %v1538_v29 }
  0x35   :  { %1340 = vmatpush3.bf16.msra.mxu0 %v1524_v59  ;;  %1373 = vmatprep.subr.bf16.mxu1 %v1539_v30 }
  0x36   :  { %1508 = vmatprep.subr.msk.bf16.mxu0 %vm155_vm3, %v1525_v43  ;;  %v1018_v43 = vld [vmem:[%s1975_s5 + $0x38] sm:$0xff] }
  0x37   :  { %v1471_v44 = vpack.c.bf16 %v1018_v43, %v1017_v42 }
  0x38   :  { %1374 = vmatpush3.bf16.msra.mxu1 %v1539_v30 }
  0x39   :  { %1342 = vmatpush3.bf16.msra.mxu0 %v252_v54  ;;  %1375 = vmatprep.subr.bf16.mxu1 %v1540_v31 }
  0x3a   :  { %1347 = vmatprep.subr.bf16.mxu0 %v1527_v60 }
  0x3c   :  { %1344 = vmatmul.mubr.msk.bf16.vlgmr.msra.gmra.mrb[0].mxu0 %vm148_vm4, %v1155_v63  ;;  %1376 = vmatpush3.bf16.msra.mxu1 %v1540_v31 }
  0x3d   :  { %1348 = vmatpush3.bf16.msra.mxu0 %v1527_v60  ;;  %1357 = vmatprep.mubr.msk.bf16.mxu0 %vm148_vm4, %v1165_v0 }
  0x3e   :  { %1349 = vmatprep.subr.bf16.mxu0 %v1529_v1  ;;  %1381 = vmatprep.subr.bf16.mxu1 %v1789_v32 }
  0x41   :  { %1350 = vmatpush3.bf16.msra.mxu0 %v1529_v1 }
  0x42   :  { %1351 = vmatprep.subr.bf16.mxu0 %v1530_v2 }
  0x45   :  { %1352 = vmatpush3.bf16.msra.mxu0 %v1530_v2 }
  0x46   :  { %1353 = vmatprep.subr.bf16.mxu0 %v1531_v4 }
  0x49   :  { %1354 = vmatpush3.bf16.msra.mxu0 %v1531_v4 }
  0x4a   :  { %1509 = vmatprep.subr.msk.bf16.mxu0 %vm155_vm3, %v1532_v9 }
  0x4d   :  { %1356 = vmatpush3.bf16.msra.mxu0 %v376_v12 }
  0x4e   :  { %1460 = vmatprep.subr.bf16.mxu0 %v1459_v36 }
  0x50   :  { %1358 = vmatmul.mubr.msk.bf16.vlgmr.msra.gmra.mrb[0].mxu0 %vm148_vm4, %v1166_v13  ;;  %vm1833_vm4 = vmand %vm155_vm3, %vm463_vm11 }
  0x51   :  { %1462 = vmatpush3.bf16.msra.mxu0 %v1459_v36 }
  0x52   :  { %1464 = vmatprep.subr.bf16.mxu0 %v1463_v38 }
  0x55   :  { %1466 = vmatpush3.bf16.msra.mxu0 %v1463_v38 }
  0x56   :  { %1468 = vmatprep.subr.bf16.mxu0 %v1467_v41 }
  0x59   :  { %1470 = vmatpush3.bf16.msra.mxu0 %v1467_v41 }
  0x5a   :  { %1472 = vmatprep.subr.bf16.mxu0 %v1471_v44 }
  0x5d   :  { %1474 = vmatpush3.bf16.msra.mxu0 %v1471_v44 }
  0x5e   :  { %1476 = vmatprep.subr.bf16.mxu0 %v1475_v47 }
  0x61   :  { %1478 = vmatpush3.bf16.msra.mxu0 %v1475_v47 }
  0x62   :  { %1480 = vmatprep.subr.bf16.mxu0 %v1479_v50 }
  0x65   :  { %1482 = vmatpush3.bf16.msra.mxu0 %v1479_v50 }
 0x123   :  { %v1359_v52 = vpop.f32.mrb[0].mxu0 }
 0x124   :  { %v440_v53 = vadd.f32 %v1359_v52, %v1174_v51  ;;  %v412_v54 = vpop.f32.mrb[1].mxu0 }
 0x125   :  { %v438_v55 = vadd.f32 %v1174_v51, %v412_v54  ;;  %v1360_v56 = vpop.f32.mrb[2].mxu0 }
 0x126   :  { %vm444_vm13 = vcmp.gt.f32.partialorder %v440_v53, 0.0  ;;  %v448_v57 = vmul.f32 0.01, %v440_v53  ;;  %v441_v59 = vadd.f32 %v1360_v56, %v1174_v51  ;;  %v415_v60 = vpop.f32.mrb[3].mxu0 }
 0x127   :  { %vm442_vm14 = vcmp.gt.f32.partialorder %v438_v55, 0.0  ;;  %v446_v61 = vmul.f32 0.01, %v438_v55  ;;  %v439_v62 = vadd.f32 %v1174_v51, %v415_v60 }
 0x128   :  { %v452_v63 = vsel %vm444_vm13, %v440_v53, %v448_v57  ;;  %vm445_vm15 = vcmp.gt.f32.partialorder %v441_v59, 0.0  ;;  %v449_v0 = vmul.f32 0.01, %v441_v59 }
 0x129   :  { %v1246_v1 = vpack.c.bf16 %v452_v63, %v452_v63  ;;  %v450_v2 = vsel %vm442_vm14, %v438_v55, %v446_v61  ;;  %vm443_vm0 = vcmp.gt.f32.partialorder %v439_v62, 0.0  ;;  %v447_v3 = vmul.f32 0.01, %v439_v62 }
 0x12a   :  { %v1244_v4 = vpack.c.bf16 %v450_v2, %v450_v2  ;;  %v453_v5 = vsel %vm445_vm15, %v441_v59, %v449_v0 }
 0x12b   :  { %v503_v6 = vshrl.u32 %v1246_v1, 16  ;;  %v1247_v7 = vpack.c.bf16 %v453_v5, %v453_v5  ;;  %v451_v8 = vsel %vm443_vm0, %v439_v62, %v447_v3  ;;  %v506_v12 = vshll.u32 %v1246_v1, 16 }
 0x12c   :  { %v486_v9 = vshrl.u32 %v1244_v4, 16  ;;  %v1245_v10 = vpack.c.bf16 %v451_v8, %v451_v8  ;;  %v489_v18 = vshll.u32 %v1244_v4, 16 }
 0x12d   :  { %v505_v11 = vrot.slane %v503_v6, 7  ;;  %v511_v13 = vshrl.u32 %v1247_v7, 16  ;;  %v514_v23 = vshll.u32 %v1247_v7, 16 }
 0x12e   :  { %v488_v17 = vrot.slane %v486_v9, 7  ;;  %v494_v19 = vshrl.u32 %v1245_v10, 16  ;;  %v497_v29 = vshll.u32 %v1245_v10, 16 }
 0x12f   :  { %v508_v20 = vor.u32 %v506_v12, %v505_v11  ;;  %v513_v22 = vrot.slane %v511_v13, 7  ;;  %v509_v30 = vrot.slane %v505_v11, 4 }
 0x130   :  { %v491_v25 = vor.u32 %v489_v18, %v488_v17  ;;  %v496_v28 = vrot.slane %v494_v19, 7  ;;  %v492_v36 = vrot.slane %v488_v17, 4 }
 0x131   :  { %v535_v31 = vsel %vm1833_vm4, %v508_v20, %v534_v16  ;;  %v516_v33 = vor.u32 %v514_v23, %v513_v22  ;;  %v518_v34 = vrot.slane %v513_v22, 4 }
 0x132   :  { %536 = vst [vmem:[#allocation2 + $0xc] sm:$0xf] %v535_v31  ;;  %v528_v37 = vsel %vm1833_vm4, %v491_v25, %v527_v21  ;;  %v499_v38 = vor.u32 %v497_v29, %v496_v28  ;;  %v501_v39 = vrot.slane %v496_v28, 4 }
 0x133   :  { %529 = vst [vmem:[#allocation2] sm:$0xf] %v528_v37  ;;  %v517_v40 = vsel %vm1838_vm5, %v509_v30, %v516_v33  ;;  %v539_v41 = vsel %vm1756_vm10, %v518_v34, %v538_v27  ;;  %v1543_v27 = vld [vmem:[%s1973_s3 + $0x8] sm:$0xff]   ;;  %v1545_v33 = vld [vmem:[%s1973_s3 + $0x18] sm:$0xff]   ;;  %v1546_v34 = vld [vmem:[%s1973_s3 + $0x20] sm:$0xff]  }
 0x134   :  { %537 = vst [vmem:[#allocation2 + $0x10] sm:$0xf] %v517_v40  ;;  %540 = vst [vmem:[#allocation2 + $0x14] sm:$0x1] %v539_v41  ;;  %v500_v42 = vsel %vm1838_vm5, %v492_v36, %v499_v38  ;;  %v532_v43 = vsel %vm1756_vm10, %v501_v39, %v531_v35  ;;  %v1548_v35 = vld [vmem:[%s1973_s3 + $0x30] sm:$0xff]   ;;  %v1549_v37 = vld [vmem:[%s1973_s3 + $0x38] sm:$0xff]  }
 0x135   :  { %530 = vst [vmem:[#allocation2 + $0x4] sm:$0xf] %v500_v42  ;;  %533 = vst [vmem:[#allocation2 + $0x8] sm:$0x1] %v532_v43  ;;  %v1551_v41 = vld [vmem:[%s1973_s3 + $0x80] sm:$0xff]  }
 0x139   :  { %v1854_v44 = vld [vmem:[#allocation2 + $0xc] sm:$0xf] }
 0x13a   :  { %v541_v45 = vld [vmem:[#allocation2] sm:$0xf]  ;;  %v588_v46 = vshrl.u32 %v1854_v44, 16  ;;  %v591_v47 = vshll.u32 %v1854_v44, 16  ;;  %v843_v12 = vld [vmem:[#allocation2 + $0xc] sm:$0xe] }
 0x13b   :  { %v564_v48 = vshrl.u32 %v541_v45, 16  ;;  %v567_v49 = vshll.u32 %v541_v45, 16  ;;  %v1858_v50 = vld [vmem:[#allocation2 + $0x10] sm:$0xf]  ;;  %v562_v60 = vld [vmem:[#allocation2 + $0x14] sm:$0x1] }
 0x13c   :  { %v1860_v51 = vld [vmem:[#allocation2 + $0x4] sm:$0xf]  ;;  %v1862_v52 = vld [vmem:[#allocation2 + $0x8] sm:$0x1]  ;;  %v590_v53 = vrot.slane %v588_v46, 4  ;;  %v593_v15 = vrot.slane %v591_v47, 5 }
 0x13d   :  { %v566_v54 = vrot.slane %v564_v48, 4  ;;  %v569_v55 = vrot.slane %v567_v49, 5  ;;  %v573_v56 = vshll.u32 %v1860_v51, 16  ;;  %v577_v57 = vshrl.u32 %v1860_v51, 16  ;;  %v842_v39 = vld [vmem:[#allocation2] sm:$0xe] }
 0x13e   :  { %v583_v59 = vshll.u32 %v1862_v52, 16  ;;  %v594_v61 = vor.u32 %v593_v15, %v590_v53  ;;  %v597_v62 = vshll.u32 %v1858_v50, 16  ;;  %v601_v2 = vshrl.u32 %v1858_v50, 16  ;;  %v1552_v47 = vld [vmem:[%s1973_s3 + $0x88] sm:$0xff]   ;;  %v1553_v49 = vld [vmem:[%s1973_s3 + $0x90] sm:$0xff]   ;;  %v1023_v53 = vld [vmem:[%s1975_s5 + $0x60] sm:$0xff] }
 0x13f   :  { %v570_v63 = vor.u32 %v569_v55, %v566_v54  ;;  %v575_v0 = vrot.slane %v573_v56, 5  ;;  %v579_v1 = vrot.slane %v577_v57, 4  ;;  %v607_v7 = vshll.u32 %v562_v60, 16  ;;  %v1024_v15 = vld [vmem:[%s1975_s5 + $0x68] sm:$0xff]  ;;  %v1025_v55 = vld [vmem:[%s1975_s5 + $0x70] sm:$0xff]  ;;  %v1026_v56 = vld [vmem:[%s1975_s5 + $0x78] sm:$0xff] }
 0x140   :  { %v599_v3 = vrot.slane %v597_v62, 5  ;;  %v603_v6 = vrot.slane %v601_v2, 4  ;;  %v585_v9 = vrot.slane %v583_v59, 5  ;;  %v595_v10 = vrot.slane %v594_v61, 4  ;;  %v1243_v59 = vld [vmem:[%s1974_s4] ss:$0 sm:$0xff] }
 0x141   :  { %v571_v4 = vrot.slane %v570_v63, 4  ;;  %v580_v5 = vor.u32 %v579_v1, %v575_v0  ;;  %v857_v13 = vrot.slane %v1858_v50, 5  ;;  %v609_v18 = vrot.slane %v607_v7, 5  ;;  %s1610_s4 = smov [#allocation7]  }
 0x142   :  { %v604_v11 = vor.u32 %v603_v6, %v599_v3  ;;  %v860_v20 = vrot.slane %v562_v60, 5  ;;  %v1216_v21 = vrot.slane %v843_v12, 9  ;;  %v600_v23 = vsel %vm1699_vm2, %v595_v10, %v599_v3  ;;  %s1133_s5 = sshll.u32 %s1610_s4, 4  ;;  %s1134_s5 = int_to_ptr.vmem [resolvable:$true] %s1133_s5 }
 0x143   :  { %v581_v8 = vrot.slane %v580_v5, 4  ;;  %v576_v14 = vsel %vm1699_vm2, %v571_v4, %v575_v0  ;;  %v859_v22 = vrot.slane %v857_v13, 4  ;;  %v1205_v30 = vcombine.low %v541_v45, %v1860_v51  ;;  %s1581_s28 = scalar_lea.vmem %s1134_s5, 256  ;;  %p1586_p9 = scmp.lt.s32.totalorder %s1134_s5, %s1134_s5 }
 0x144   :  { %v605_v17 = vrot.slane %v604_v11, 4  ;;  %v858_v28 = vsel %vm1727_vm7, %v1216_v21, %v857_v13  ;;  %v850_v36 = vrot.slane %v1860_v51, 5  ;;  %v853_v40 = vrot.slane %v1862_v52, 5  ;;  %v1557_v51 = vld [vmem:[%s1973_s3 + $0xb0] sm:$0xff]   ;;  %v1558_v52 = vld [vmem:[%s1973_s3 + $0xb8] sm:$0xff]   ;;  %p1582_p8 = scmp.ne.s32.totalorder %s1134_s5, %s1581_s28  ;;  %p1587_p10 = scmp.lt.s32.totalorder %s1581_s28, %s1581_s28 }
 0x145   :  { %v586_v16 = vsel %vm1699_vm2, %v581_v8, %v585_v9  ;;  %v861_v29 = vsel %vm1727_vm7, %v859_v22, %v860_v20  ;;  %v1215_v42 = vrot.slane %v842_v39, 9  ;;  %v1206_v45 = vcombine.low %v1854_v44, %v1858_v50  ;;  %v1555_v44 = vld [vmem:[%s1973_s3 + $0xa0] sm:$0xff]   ;;  %v1556_v50 = vld [vmem:[%s1973_s3 + $0xa8] sm:$0xff]  }
 0x146   :  { %v1195_v19 = vcombine.low %v576_v14, %v586_v16  ;;  %v610_v25 = vsel %vm1699_vm2, %v605_v17, %v609_v18  ;;  %v1234_v31 = vcombine.low %v858_v28, %v861_v29  ;;  %v852_v38 = vrot.slane %v850_v36, 4  ;;  %p1588_p11 = por %p1587_p10, %p1586_p9 }
 0x147   :  { %v1196_v26 = vcombine.low %v600_v23, %v610_v25  ;;  %v851_v46 = vsel %vm1727_vm7, %v1215_v42, %v850_v36  ;;  %v1483_v54 = vpack.c.bf16 %v1024_v15, %v1023_v53  ;;  %v1487_v57 = vpack.c.bf16 %v1026_v56, %v1025_v55 }
 0x148   :  { %1377 = vmatprep.mubr.bf16.mxu1 %v1195_v19  ;;  %v854_v43 = vsel %vm1727_vm7, %v852_v38, %v853_v40  ;;  %p1589_p12 = pnand %p1588_p11, %p1582_p8 }
 0x149   :  { %1378 = vmatmul.mubr.bf16.vlgmr.msra.gmra.mrb[0].mxu1 %v1196_v26  ;;  %v1233_v48 = vcombine.low %v851_v46, %v854_v43  ;;  %1484 = vmatprep.subr.bf16.mxu0 %v1483_v54 }
 0x14a   :  { %1382 = vmatpush3.bf16.msra.mxu1 %v1789_v32  ;;  %1397 = vmatprep.mubr.bf16.mxu1 %v1205_v30  ;;  %v1547_v32 = vld [vmem:[%s1973_s3 + $0x28] sm:$0xff]  }
 0x14b   :  { %1383 = vmatprep.subr.bf16.mxu1 %v1543_v27  ;;  %1486 = vmatpush3.bf16.msra.mxu0 %v1483_v54 }
 0x14c   :  { %1488 = vmatprep.subr.bf16.mxu0 %v1487_v57 }
 0x14e   :  { %1384 = vmatpush3.bf16.msra.mxu1 %v1543_v27 }
 0x14f   :  { %1385 = vmatprep.subr.bf16.mxu1 %v1544_v24  ;;  %1490 = vmatpush3.bf16.msra.mxu0 %v1487_v57 }
 0x152   :  { %1386 = vmatpush3.bf16.msra.mxu1 %v1544_v24 }
 0x153   :  { %1387 = vmatprep.subr.bf16.mxu1 %v1545_v33 }
 0x156   :  { %1388 = vmatpush3.bf16.msra.mxu1 %v1545_v33 }
 0x157   :  { %1389 = vmatprep.subr.bf16.mxu1 %v1546_v34 }
 0x15a   :  { %1390 = vmatpush3.bf16.msra.mxu1 %v1546_v34 }
 0x15b   :  { %1391 = vmatprep.subr.bf16.mxu1 %v1547_v32 }
 0x15e   :  { %1392 = vmatpush3.bf16.msra.mxu1 %v1547_v32 }
 0x15f   :  { %1393 = vmatprep.subr.bf16.mxu1 %v1548_v35 }
 0x162   :  { %1394 = vmatpush3.bf16.msra.mxu1 %v1548_v35 }
 0x163   :  { %1395 = vmatprep.subr.bf16.mxu1 %v1549_v37 }
 0x166   :  { %1396 = vmatpush3.bf16.msra.mxu1 %v1549_v37 }
 0x167   :  { %1401 = vmatprep.subr.bf16.mxu1 %v1551_v41 }
 0x169   :  { %1398 = vmatmul.mubr.bf16.vlgmr.msra.gmra.mrb[0].mxu1 %v1206_v45 }
 0x16a   :  { %1402 = vmatpush3.bf16.msra.mxu1 %v1551_v41  ;;  %1417 = vmatprep.mubr.bf16.mxu1 %v1233_v48 }
 0x16b   :  { %1403 = vmatprep.subr.bf16.mxu1 %v1552_v47 }
 0x16e   :  { %1404 = vmatpush3.bf16.msra.mxu1 %v1552_v47 }
 0x16f   :  { %1405 = vmatprep.subr.bf16.mxu1 %v1553_v49 }
 0x172   :  { %1406 = vmatpush3.bf16.msra.mxu1 %v1553_v49 }
 0x173   :  { %1407 = vmatprep.subr.bf16.mxu1 %v1554_v58 }
 0x176   :  { %1408 = vmatpush3.bf16.msra.mxu1 %v1554_v58 }
 0x177   :  { %1409 = vmatprep.subr.bf16.mxu1 %v1555_v44 }
 0x17a   :  { %1410 = vmatpush3.bf16.msra.mxu1 %v1555_v44 }
 0x17b   :  { %1411 = vmatprep.subr.bf16.mxu1 %v1556_v50 }
 0x17e   :  { %1412 = vmatpush3.bf16.msra.mxu1 %v1556_v50 }
 0x17f   :  { %1413 = vmatprep.subr.bf16.mxu1 %v1557_v51 }
 0x182   :  { %1414 = vmatpush3.bf16.msra.mxu1 %v1557_v51 }
 0x183   :  { %1415 = vmatprep.subr.bf16.mxu1 %v1558_v52 }
 0x186   :  { %1416 = vmatpush3.bf16.msra.mxu1 %v1558_v52 }
 0x189   :  { %1418 = vmatmul.mubr.bf16.vlgmr.msra.gmra.mrb[0].mxu1 %v1234_v31 }
 0x25c   :  { %v1419_v60 = vpop.f32.mrb[0].mxu1 }
 0x25d   :  { %v997_v61 = vadd.f32 %v1419_v60, %v1243_v59  ;;  %v969_v62 = vpop.f32.mrb[1].mxu1 }
 0x25e   :  { %v995_v63 = vadd.f32 %v1243_v59, %v969_v62  ;;  %v1420_v0 = vpop.f32.mrb[2].mxu1 }
 0x25f   :  { %v972_v1 = vpop.f32.mrb[3].mxu1  ;;  %v998_v3 = vadd.f32 %v1420_v0, %v1243_v59  ;;  %v1005_v5 = vmul.f32 0.01, %v997_v61  ;;  %vm1001_vm6 = vcmp.gt.f32.partialorder %v997_v61, 0.0 }
 0x260   :  { %v1003_v2 = vmul.f32 0.01, %v995_v63  ;;  %v996_v4 = vadd.f32 %v1243_v59, %v972_v1  ;;  %vm999_vm2 = vcmp.gt.f32.partialorder %v995_v63, 0.0 }
 0x261   :  { %v1006_v8 = vmul.f32 0.01, %v998_v3  ;;  %v1009_v10 = vsel %vm1001_vm6, %v997_v61, %v1005_v5  ;;  %vm1002_vm7 = vcmp.gt.f32.partialorder %v998_v3, 0.0 }
 0x262   :  { %vm1000_vm3 = vcmp.gt.f32.partialorder %v996_v4, 0.0  ;;  %v1004_v6 = vmul.f32 0.01, %v996_v4  ;;  %v1007_v7 = vsel %vm999_vm2, %v995_v63, %v1003_v2 }
 0x263   :  { %1453 = vmatprep.mubr.f32.mxu0 %v1007_v7  ;;  %v1010_v11 = vsel %vm1002_vm7, %v998_v3, %v1006_v8 }
 0x264   :  { %v1008_v9 = vsel %vm1000_vm3, %v996_v4, %v1004_v6 }
 0x265   :  { %1454 = vmatmul.mubr.f32.vlgmr.msra.gmra.mrb[4].mxu0 %v1008_v9 }
 0x266   :  { %1456 = vmatprep.mubr.f32.mxu0 %v1009_v10 }
 0x269   :  { %1457 = vmatmul.mubr.f32.gmra.mrb[6].mxu0 %v1010_v11 }
 0x338   :  { %v1455_v12 = vpop.f32.mrb[4].mxu0 }
 0x339   :  { %1114 = vst.msk [vmem:[#allocation3 + $0x8] sm:$0xff] %vm1112_vm8, %v1455_v12  ;;  %v1093_v13 = vpop.f32.mrb[5].mxu0 }
 0x33a   :  { %1113 = vst.msk [vmem:[#allocation3] sm:$0xff] %vm1112_vm8, %v1093_v13 }
 0x33c   :  { %v1458_v14 = vpop.f32.mrb[6].mxu0 }
 0x33d   :  { %1116 = vst.msk [vmem:[#allocation3 + $0x18] sm:$0xff] %vm1112_vm8, %v1458_v14  ;;  %v1103_v16 = vpop.f32.mrb[7].mxu0 }
 0x33e   :  { %1115 = vst.msk [vmem:[#allocation3 + $0x10] sm:$0xff] %vm1112_vm8, %v1103_v16 }
 0x341   :  { %v1117_v17 = vld [vmem:[#allocation3] ss:$2 sm:$0xff]  ;;  %v1121_v18 = vld [vmem:[#allocation3 + $0x1] ss:$2 sm:$0xff] }
 0x342   :  { %v1124_v19 = vadd.f32 %v1121_v18, %v1117_v17 }
 0x344   :  { %1126 = vst.msk [vmem:[#allocation7] sm:$0xff] %vm1112_vm8, %v1124_v19 }
 0x345   :  { %v1119_v20 = vld [vmem:[#allocation3 + $0x10] ss:$2 sm:$0xff]  ;;  %v1123_v21 = vld [vmem:[#allocation3 + $0x11] ss:$2 sm:$0xff] }
 0x346   :  { %v1125_v22 = vadd.f32 %v1123_v21, %v1119_v20 }
 0x348   :  { %1127 = vst.msk [vmem:[#allocation7 + $0x8] sm:$0xff] %vm1112_vm8, %v1125_v22 }
 0x349   :  { %1592 = shalt.err (!%p1589_p12)
}
 0x34a   :  { %s1593_s7 = scalar_lea.hbm %s1976_s6, 256 }
 0x34b   :  { %p1594_p13 = scmp.ne.s32.totalorder %s1976_s6, %s1593_s7  ;;  %p1597_p0 = scmp.lt.u32.totalorder %s1593_s7, %s1976_s6 }
 0x34d   :  { %p1599_p1 = pnand %p1597_p0, %p1594_p13 }
 0x34f   :  { %1602 = shalt.err (!%p1599_p1)
}
 0x350   :  { %s1611_s12 = smov 128   ;;  %s1612_s13 = smov 8  }
 0x351   :  { %1139 = dma.vmem_to_hbm [thread:$0]  %s1134_s5, 256, %s1976_s6, [#allocation6], %s1611_s12, %s1611_s12, %s1612_s13  }
 0x352   :  { %1605 = dma.done.wait [#allocation6], 256  }
 0x353   :  { %1606 = vsyncadd [#allocation6], 4294967040 }
 0x354   :  { %1143 = vsyncpa [#allocation5], 1 }
 0x355   :  { %1144 = vsyncpa [#allocation6], 1 }

</bundles_post_ra>
